<compile_context>
chip_gen: v5e
topology: v5e:2x2
jax: 0.10.0
libtpu: 0.0.40
codegen_flags: <defaults>
</compile_context>

<pallas_src>
import functools

import jax
import jax.numpy as jnp
from jax import lax
from jax.experimental import pallas as pl
from jax.experimental.pallas import tpu as pltpu

QUANTILES = (0.1, 0.5, 0.9)
NQ = len(QUANTILES)
NT = NQ + 1  # num_tasks = len(quantiles) + 1


def _cdiv(a, b):
    return (a + b - 1) // b


def _multitask_partial_kernel(q_ref, x_ref, w_ref, b_ref, t_ref, o_ref, acc_ref,
                              *, b_true, tb, bpc, nq):
    """One batch tile -> per-task partial loss sums (lane-dense layout).

    q_ref : (nt, 1)   quantile values, last row 0 (resident)
    x_ref : (tb, F)   f32 batch tile (streamed from HBM)
    w_ref : (nt, F)   bf16 W^T (resident)
    b_ref : (nt, 1)   f32 bias (resident)
    t_ref : (1, tb)   f32 target tile (lanes)
    o_ref : (1, nt, 1) per-core-half per-task partial sums
    acc_ref:(nt, 1)   f32 running per-task sums (VMEM scratch)
    """
    nt = nq + 1
    c = pl.program_id(0)   # core-half axis ("parallel": one per TC on v7x)
    j = pl.program_id(1)   # tile axis within the half ("arbitrary", carries acc)

    @pl.when(j == 0)
    def _init():
        acc_ref[...] = jnp.zeros_like(acc_ref)

    # ---- inner model forward, lane-dense: out^T = W^T x^T + b  -> (nt, tb) ----
    x_bf = x_ref[...].astype(jnp.bfloat16)                 # in-kernel cast (f32 HBM stream)
    out_t = lax.dot_general(
        w_ref[...], x_bf,
        dimension_numbers=(((1,), (1,)), ((), ())),        # contract both F dims
        preferred_element_type=jnp.float32) + b_ref[...]   # (nt, tb)

    err = t_ref[...] - out_t                               # (1,tb) bcast -> (nt, tb)

    # Per-task loss: pinball for rows 0..nq-1, squared error for row nq.
    qv = q_ref[...]                                        # (nt, 1)
    is_q = lax.broadcasted_iota(jnp.int32, (nt, 1), 0) < nq
    pin = jnp.maximum((qv - 1.0) * err, qv * err)          # (nt, tb)
    per = jnp.where(is_q, pin, err * err)                  # (nt, tb)

    # Only tiles hanging over the end of the batch pay for mask construction.
    start = (c * bpc + j) * tb            # logical first row of this tile
    hangs_over = start + tb > b_true      # also true for a fully-clamped dup block

    @pl.when(hangs_over)
    def _masked_accum():
        row = lax.broadcasted_iota(jnp.int32, (1, tb), 1) + start
        safe = jnp.where(row < b_true, per, 0.0)           # select (NaN-safe), not *0
        acc_ref[...] += jnp.sum(safe, axis=1, keepdims=True)

    @pl.when(jnp.logical_not(hangs_over))
    def _accum():
        acc_ref[...] += jnp.sum(per, axis=1, keepdims=True)

    @pl.when(j == pl.num_programs(1) - 1)
    def _finalize():
        o_ref[...] = acc_ref[...].reshape(1, nt, 1)


def _choose_tile(B, F, vmem_cap_bytes):
    # Double-buffered f32 x tile + target tile should use ~1/4 of chip VMEM,
    # which for small F gives multi-MiB tiles (amortizes per-step overhead) and
    # for large F keeps us well inside the scoped VMEM limit.
    budget = vmem_cap_bytes // 4
    bytes_per_row = F * 4 + 4
    return budget // (2 * bytes_per_row)


def multitask_wrapper_loss(x, w, b, target, log_vars, quantiles=QUANTILES, tb=None):
    """Pallas implementation of MultiTaskWrapper.forward for a linear model."""
    B, F = x.shape
    nq = len(quantiles)
    nt = nq + 1

    try:
        # 128 MiB on v5e/v6e, 64 MiB per-TC on v7x -> tb auto-adapts per chip.
        vmem_cap = pltpu.get_tpu_info().vmem_capacity_bytes
    except Exception:
        vmem_cap = 64 * 1024 * 1024  # conservative fallback
    if tb is None:
        tb = _choose_tile(B, F, vmem_cap)
    if tb >= B:
        tb = B                                 # single full block per core half
    else:
        tb = max(128, (tb // 128) * 128)       # lane / bf16-sublane aligned tiles

    total_blocks = _cdiv(B, tb)
    bpc = _cdiv(total_blocks, 2)               # batch tiles per core half
    last_blk = total_blocks - 1

    # Tiny resident operands (transposed once for the lane-dense layout).
    w_t = jnp.asarray(w).astype(jnp.bfloat16).T            # (nt, F)
    b2 = jnp.asarray(b, jnp.float32).reshape(nt, 1)
    q_arr = jnp.asarray(list(quantiles) + [0.0], jnp.float32).reshape(nt, 1)
    t2 = jnp.asarray(target, jnp.float32).reshape(1, B)

    kernel = functools.partial(_multitask_partial_kernel,
                               b_true=B, tb=tb, bpc=bpc, nq=nq)

    # Clamp the block index so the (rare) duplicate block of an odd split stays
    # in bounds; its rows are fully masked inside the kernel.
    def x_map(c, j):
        return (jnp.minimum(c * bpc + j, last_blk), 0)

    def t_map(c, j):
        return (0, jnp.minimum(c * bpc + j, last_blk))

    partials = pl.pallas_call(
        kernel,
        out_shape=jax.ShapeDtypeStruct((2, nt, 1), jnp.float32),
        grid_spec=pltpu.PrefetchScalarGridSpec(
            num_scalar_prefetch=0,
            grid=(2, bpc),
            in_specs=[
                pl.BlockSpec((nt, 1), lambda c, j: (0, 0)),   # quantiles (resident)
                pl.BlockSpec((tb, F), x_map),                  # x tile (f32 HBM stream)
                pl.BlockSpec((nt, F), lambda c, j: (0, 0)),    # W^T (resident, bf16)
                pl.BlockSpec((nt, 1), lambda c, j: (0, 0)),    # bias (resident)
                pl.BlockSpec((1, tb), t_map),                  # target tile (lanes)
            ],
            out_specs=pl.BlockSpec((1, nt, 1), lambda c, j: (c, 0, 0)),
            scratch_shapes=[pltpu.VMEM((nt, 1), jnp.float32)],
        ),
        compiler_params=pltpu.CompilerParams(
            dimension_semantics=("parallel", "arbitrary"),
            vmem_limit_bytes=int(vmem_cap // 2),
        ),
        cost_estimate=pl.CostEstimate(
            flops=2 * B * F * nt,
            transcendentals=0,
            bytes_accessed=B * F * 4 + B * 4 + nt * F * 2 + 3 * nt * 4,
        ),
    )(q_arr, x, w_t, b2, t2)

    # Tiny epilogue on the (2, nt) per-task partial sums (O(nt) work, plain JAX).
    lv = jnp.asarray(log_vars, jnp.float32).reshape(nt)
    per_task_mean = partials.reshape(2, nt).sum(axis=0) / B
    return jnp.sum(per_task_mean * jnp.exp(-2.0 * lv) + lv)


def reference_loss(x, w, b, target, log_vars, quantiles=QUANTILES):
    """Plain-JAX transcription of the PyTorch forward (bf16 matmul to match)."""
    out = jnp.dot(x.astype(jnp.bfloat16), w.astype(jnp.bfloat16),
                  preferred_element_type=jnp.float32) + b.astype(jnp.float32)
    pred = out[:, -1]
    qpred = out[:, :-1]
    t = target.astype(jnp.float32).reshape(-1)
    mse = jnp.mean((pred - t) ** 2)
    adj_mse = mse / jnp.exp(2.0 * log_vars[-1]) + log_vars[-1]
    losses = []
    for i, q in enumerate(quantiles):
        err = t - qpred[:, i]
        q_l = jnp.maximum((q - 1.0) * err, q * err)[:, None]
        losses.append(q_l / jnp.exp(2.0 * log_vars[i]) + log_vars[i])
    bbq = jnp.concatenate(losses, axis=1)
    q_loss = jnp.mean(jnp.sum(bbq, axis=1))
    return adj_mse + q_loss


if __name__ == "__main__":
    key = jax.random.PRNGKey(0)
    kx, kt, kw, kb, kx2, kt2 = jax.random.split(key, 6)

    # --- small test (single tile per core half) ---
    B, F = 8, 32
    x = jax.random.normal(kx, (B, F), dtype=jnp.float32)
    target = jax.random.normal(kt, (B,), dtype=jnp.float32)
    w = jax.random.normal(kw, (F, NT), dtype=jnp.float32) * 0.1
    b = jax.random.normal(kb, (NT,), dtype=jnp.float32) * 0.1
    log_vars = jnp.zeros((NT,), dtype=jnp.float32)  # nn.Parameter(torch.zeros(num_tasks))

    loss = jax.block_until_ready(multitask_wrapper_loss(x, w, b, target, log_vars))
    ref = reference_loss(x, w, b, target, log_vars)
    assert jnp.allclose(loss, ref, rtol=1e-3, atol=1e-3), (loss, ref)

    # --- ragged, multi-tile test: B=300, tb=128 -> 3 real tiles + 1 masked
    #     duplicate tile, exercising both core halves and the masked path ---
    B2 = 300
    x2 = jax.random.normal(kx2, (B2, F), dtype=jnp.float32)
    target2 = jax.random.normal(kt2, (B2,), dtype=jnp.float32)
    lv2 = jnp.full((NT,), 0.1, dtype=jnp.float32)

    loss2 = jax.block_until_ready(
        multitask_wrapper_loss(x2, w, b, target2, lv2, tb=128))
    ref2 = reference_loss(x2, w, b, target2, lv2)
    assert jnp.allclose(loss2, ref2, rtol=1e-3, atol=1e-3), (loss2, ref2)

    print("KERNEL_OK")
</pallas_src>

<mosaic_0001>
module attributes {stable_mosaic.version = 11 : i64} {
  func.func @_multitask_partial_kernel(%arg0: i32, %arg1: i32, %arg2: memref<4x1xf32, #tpu.memory_space<vmem>>, %arg3: memref<8x32xf32, #tpu.memory_space<vmem>>, %arg4: memref<4x32xbf16, #tpu.memory_space<vmem>>, %arg5: memref<4x1xf32, #tpu.memory_space<vmem>>, %arg6: memref<1x8xf32, #tpu.memory_space<vmem>>, %arg7: memref<1x4x1xf32, #tpu.memory_space<vmem>>, %arg8: memref<4x1xf32, #tpu.memory_space<vmem>>) attributes {dimension_semantics = [#tpu.dimension_semantics<parallel>, #tpu.dimension_semantics<arbitrary>], iteration_bounds = array<i64: 2, 1>, scalar_prefetch = 0 : i64, scratch_operands = 1 : i64, tpu.core_type = #tpu.core_type<tc>, window_params = [{pipeline_mode = #tpu.pipeline_mode<synchronous>, transform_indices = @transform_0, window_bounds = array<i64: 4, 1>}, {transform_indices = @transform_1, window_bounds = array<i64: 8, 32>}, {pipeline_mode = #tpu.pipeline_mode<synchronous>, transform_indices = @transform_2, window_bounds = array<i64: 4, 32>}, {pipeline_mode = #tpu.pipeline_mode<synchronous>, transform_indices = @transform_3, window_bounds = array<i64: 4, 1>}, {transform_indices = @transform_4, window_bounds = array<i64: 1, 8>}, {transform_indices = @transform_5, window_bounds = array<i64: 1, 4, 1>}]} {
    %c0_i32 = arith.constant 0 : i32
    %0 = arith.cmpi eq, %arg1, %c0_i32 : i32
    %1 = arith.extui %0 : i1 to i32
    %c0_i32_0 = arith.constant 0 : i32
    %2 = arith.cmpi ne, %1, %c0_i32_0 : i32
    scf.if %2 {
      %cst_17 = arith.constant 0.000000e+00 : f32
      %41 = vector.broadcast %cst_17 : f32 to vector<4x1xf32>
      %c0_18 = arith.constant 0 : index
      %c0_19 = arith.constant 0 : index
      %42 = vector.load %arg8[%c0_18, %c0_19] : memref<4x1xf32, #tpu.memory_space<vmem>>, vector<4x1xf32>
      tpu.vector_store %arg8[%c0_18, %c0_19], %41 {strides = array<i32>} : memref<4x1xf32, #tpu.memory_space<vmem>>, vector<4x1xf32>,
    } else {
    }
    %c0 = arith.constant 0 : index
    %c0_1 = arith.constant 0 : index
    %3 = vector.load %arg3[%c0, %c0_1] : memref<8x32xf32, #tpu.memory_space<vmem>>, vector<8x32xf32>
    %4 = arith.truncf %3 : vector<8x32xf32> to vector<8x32xbf16>
    %c0_2 = arith.constant 0 : index
    %c0_3 = arith.constant 0 : index
    %5 = vector.load %arg4[%c0_2, %c0_3] : memref<4x32xbf16, #tpu.memory_space<vmem>>, vector<4x32xbf16>
    %cst = arith.constant dense<0.000000e+00> : vector<4x8xf32>
    %6 = tpu.matmul %5, %4, %cst {dimension_numbers = #tpu.dot_dimension_numbers<[1], [1], [0], [0], [0, 0, 1, 0], [], []>} : vector<4x32xbf16>, vector<8x32xbf16>, vector<4x8xf32> -> vector<4x8xf32>
    %c0_4 = arith.constant 0 : index
    %c0_5 = arith.constant 0 : index
    %7 = vector.load %arg5[%c0_4, %c0_5] : memref<4x1xf32, #tpu.memory_space<vmem>>, vector<4x1xf32>
    %8 = vector.broadcast %7 : vector<4x1xf32> to vector<4x8xf32>
    %9 = arith.addf %6, %8 : vector<4x8xf32>
    %c0_6 = arith.constant 0 : index
    %c0_7 = arith.constant 0 : index
    %10 = vector.load %arg6[%c0_6, %c0_7] : memref<1x8xf32, #tpu.memory_space<vmem>>, vector<1x8xf32>
    %11 = vector.broadcast %10 : vector<1x8xf32> to vector<4x8xf32>
    %12 = arith.subf %11, %9 : vector<4x8xf32>
    %c0_8 = arith.constant 0 : index
    %c0_9 = arith.constant 0 : index
    %13 = vector.load %arg2[%c0_8, %c0_9] : memref<4x1xf32, #tpu.memory_space<vmem>>, vector<4x1xf32>
    %14 = tpu.iota {dimensions = array<i32: 0>} : vector<4x1xi32>
    %c3_i32 = arith.constant 3 : i32
    %15 = vector.broadcast %c3_i32 : i32 to vector<4x1xi32>
    %16 = arith.cmpi slt, %14, %15 : vector<4x1xi32>
    %cst_10 = arith.constant 1.000000e+00 : f32
    %17 = vector.broadcast %cst_10 : f32 to vector<4x1xf32>
    %18 = arith.subf %13, %17 : vector<4x1xf32>
    %19 = vector.broadcast %18 : vector<4x1xf32> to vector<4x8xf32>
    %20 = arith.mulf %19, %12 : vector<4x8xf32>
    %21 = vector.broadcast %13 : vector<4x1xf32> to vector<4x8xf32>
    %22 = arith.mulf %21, %12 : vector<4x8xf32>
    %23 = arith.maximumf %20, %22 : vector<4x8xf32>
    %24 = arith.mulf %12, %12 : vector<4x8xf32>
    %25 = vector.shape_cast %16 : vector<4x1xi1> to vector<4x1xi1>
    %26 = vector.broadcast %25 : vector<4x1xi1> to vector<4x8xi1>
    %27 = arith.select %26, %23, %24 : vector<4x8xi1>, vector<4x8xf32>
    %c1_i32 = arith.constant 1 : i32
    %28 = arith.muli %arg0, %c1_i32 : i32
    %29 = arith.addi %28, %arg1 : i32
    %c8_i32 = arith.constant 8 : i32
    %30 = arith.muli %29, %c8_i32 : i32
    %c8_i32_11 = arith.constant 8 : i32
    %31 = arith.addi %30, %c8_i32_11 : i32
    %c8_i32_12 = arith.constant 8 : i32
    %32 = arith.cmpi sgt, %31, %c8_i32_12 : i32
    %33 = arith.extui %32 : i1 to i32
    %c0_i32_13 = arith.constant 0 : i32
    %34 = arith.cmpi ne, %33, %c0_i32_13 : i32
    scf.if %34 {
      %41 = tpu.iota {dimensions = array<i32: 1>} : vector<1x8xi32>
      %42 = vector.broadcast %30 : i32 to vector<1x8xi32>
      %43 = arith.addi %41, %42 : vector<1x8xi32>
      %c8_i32_17 = arith.constant 8 : i32
      %44 = vector.broadcast %c8_i32_17 : i32 to vector<1x8xi32>
      %45 = arith.cmpi slt, %43, %44 : vector<1x8xi32>
      %cst_18 = arith.constant 0.000000e+00 : f32
      %46 = vector.shape_cast %45 : vector<1x8xi1> to vector<1x8xi1>
      %47 = vector.broadcast %46 : vector<1x8xi1> to vector<4x8xi1>
      %48 = vector.broadcast %cst_18 : f32 to vector<4x8xf32>
      %49 = arith.select %47, %27, %48 : vector<4x8xi1>, vector<4x8xf32>
      %c0_19 = arith.constant 0 : index
      %c0_20 = arith.constant 0 : index
      %50 = vector.load %arg8[%c0_19, %c0_20] : memref<4x1xf32, #tpu.memory_space<vmem>>, vector<4x1xf32>
      %cst_21 = arith.constant dense<0.000000e+00> : vector<4xf32>
      %51 = vector.multi_reduction <add>, %49, %cst_21 [1] : vector<4x8xf32> to vector<4xf32>
      %52 = vector.shape_cast %51 : vector<4xf32> to vector<4x1xf32>
      %53 = arith.addf %50, %52 : vector<4x1xf32>
      %c0_22 = arith.constant 0 : index
      %c0_23 = arith.constant 0 : index
      %54 = vector.load %arg8[%c0_22, %c0_23] : memref<4x1xf32, #tpu.memory_space<vmem>>, vector<4x1xf32>
      tpu.vector_store %arg8[%c0_22, %c0_23], %53 {strides = array<i32>} : memref<4x1xf32, #tpu.memory_space<vmem>>, vector<4x1xf32>,
    } else {
    }
    %true = arith.constant true
    %35 = arith.xori %32, %true : i1
    %36 = arith.extui %35 : i1 to i32
    %c0_i32_14 = arith.constant 0 : i32
    %37 = arith.cmpi ne, %36, %c0_i32_14 : i32
    scf.if %37 {
      %c0_17 = arith.constant 0 : index
      %c0_18 = arith.constant 0 : index
      %41 = vector.load %arg8[%c0_17, %c0_18] : memref<4x1xf32, #tpu.memory_space<vmem>>, vector<4x1xf32>
      %cst_19 = arith.constant dense<0.000000e+00> : vector<4xf32>
      %42 = vector.multi_reduction <add>, %27, %cst_19 [1] : vector<4x8xf32> to vector<4xf32>
      %43 = vector.shape_cast %42 : vector<4xf32> to vector<4x1xf32>
      %44 = arith.addf %41, %43 : vector<4x1xf32>
      %c0_20 = arith.constant 0 : index
      %c0_21 = arith.constant 0 : index
      %45 = vector.load %arg8[%c0_20, %c0_21] : memref<4x1xf32, #tpu.memory_space<vmem>>, vector<4x1xf32>
      tpu.vector_store %arg8[%c0_20, %c0_21], %44 {strides = array<i32>} : memref<4x1xf32, #tpu.memory_space<vmem>>, vector<4x1xf32>,
    } else {
    }
    %c0_i32_15 = arith.constant 0 : i32
    %38 = arith.cmpi eq, %arg1, %c0_i32_15 : i32
    %39 = arith.extui %38 : i1 to i32
    %c0_i32_16 = arith.constant 0 : i32
    %40 = arith.cmpi ne, %39, %c0_i32_16 : i32
    scf.if %40 {
      %c0_17 = arith.constant 0 : index
      %c0_18 = arith.constant 0 : index
      %41 = vector.load %arg8[%c0_17, %c0_18] : memref<4x1xf32, #tpu.memory_space<vmem>>, vector<4x1xf32>
      %42 = vector.shape_cast %41 : vector<4x1xf32> to vector<1x4x1xf32>
      %c0_19 = arith.constant 0 : index
      %c0_20 = arith.constant 0 : index
      %c0_21 = arith.constant 0 : index
      %43 = vector.load %arg7[%c0_19, %c0_20, %c0_21] : memref<1x4x1xf32, #tpu.memory_space<vmem>>, vector<1x4x1xf32>
      tpu.vector_store %arg7[%c0_19, %c0_20, %c0_21], %42 {strides = array<i32>} : memref<1x4x1xf32, #tpu.memory_space<vmem>>, vector<1x4x1xf32>,
    } else {
    }
    return
  }
  func.func @transform_0(%arg0: i32, %arg1: i32) -> (i32, i32) {
    %c0_i32 = arith.constant 0 : i32
    %c0_i32_0 = arith.constant 0 : i32
    %c0_i32_1 = arith.constant 0 : i32
    return %c0_i32, %c0_i32_0 : i32, i32
  }
  func.func @transform_1(%arg0: i32, %arg1: i32) -> (i32, i32) {
    %c1_i32 = arith.constant 1 : i32
    %0 = arith.muli %arg0, %c1_i32 : i32
    %1 = arith.addi %0, %arg1 : i32
    %c0_i32 = arith.constant 0 : i32
    %2 = arith.minsi %1, %c0_i32 : i32
    %c0_i32_0 = arith.constant 0 : i32
    %c0_i32_1 = arith.constant 0 : i32
    return %2, %c0_i32_0 : i32, i32
  }
  func.func @transform_2(%arg0: i32, %arg1: i32) -> (i32, i32) {
    %c0_i32 = arith.constant 0 : i32
    %c0_i32_0 = arith.constant 0 : i32
    %c0_i32_1 = arith.constant 0 : i32
    return %c0_i32, %c0_i32_0 : i32, i32
  }
  func.func @transform_3(%arg0: i32, %arg1: i32) -> (i32, i32) {
    %c0_i32 = arith.constant 0 : i32
    %c0_i32_0 = arith.constant 0 : i32
    %c0_i32_1 = arith.constant 0 : i32
    return %c0_i32, %c0_i32_0 : i32, i32
  }
  func.func @transform_4(%arg0: i32, %arg1: i32) -> (i32, i32) {
    %c1_i32 = arith.constant 1 : i32
    %0 = arith.muli %arg0, %c1_i32 : i32
    %1 = arith.addi %0, %arg1 : i32
    %c0_i32 = arith.constant 0 : i32
    %2 = arith.minsi %1, %c0_i32 : i32
    %c0_i32_0 = arith.constant 0 : i32
    %c0_i32_1 = arith.constant 0 : i32
    return %c0_i32_0, %2 : i32, i32
  }
  func.func @transform_5(%arg0: i32, %arg1: i32) -> (i32, i32, i32) {
    %c0_i32 = arith.constant 0 : i32
    %c0_i32_0 = arith.constant 0 : i32
    %c0_i32_1 = arith.constant 0 : i32
    return %arg0, %c0_i32, %c0_i32_0 : i32, i32, i32
  }
}

</mosaic_0001>

<bundles_post_ra>
// kernel: tpu_custom_call.1
= control target key start
LH: loop header
LB: loop body
LE: loop exit
PB: predicated region body
PF: predicated region fallthrough
CT: control target
= control target key end

     0   :  { %s567_s18 = smov 0   ;;  %s569_s19 = smov 0   ;;  %s634_s0 = inlined_call_operand.vmem [shape: f32[4,1], index: 0, kind: input, shape index: {}]   ;;  %s635_s1 = inlined_call_operand.vmem [shape: f32[8,32], index: 1, kind: input, shape index: {}]   ;;  %s636_s2 = inlined_call_operand.vmem [shape: bf16[4,32], index: 2, kind: input, shape index: {}]   ;;  %s637_s3 = inlined_call_operand.vmem [shape: f32[4,1], index: 3, kind: input, shape index: {}]   ;;  %s638_s4 = inlined_call_operand.vmem [shape: f32[1,8], index: 4, kind: input, shape index: {}]   ;;  %s639_s5 = inlined_call_operand.vmem [shape: f32[2,4,1], index: 5, kind: output, shape index: {}]  }
   0x1   :  { %s571_s20 = smov 0  }
   0x2 LB: > { %s27_s21 = sadd.s32 1, %s529_s19  ;;  %p466_p0 = scmp.ge.s32.totalorder %s533_s20, 1  ;;  %s533_s20 = sphi %s571_s20, %s15_s20   ;;  %s529_s19 = sphi %s569_s19, %s641_s19   ;;  %s525_s18 = sphi %s567_s18, %s640_s18  }
   0x3   : > { %p29_p1 = scmp.ge.s32.totalorder %s27_s21, 2  ;;  %p230_p2 = scmp.lt.s32.totalorder %s533_s20, 3 }
   0x5   : > { %s643_s21 = smov (%p29_p1, %s27_s21), 0  ;;  %p231_p3 = pnand %p466_p0, %p230_p2 }
   0x6   : > { %p266_p4 = scmp.lt.s32.totalorder (!%p231_p3), %s525_s18, 0  ;;  %p284_p5 = scmp.lt.s32.totalorder (!%p231_p3), %s525_s18, 1 }
   0x7   : > { %234 = sbr.rel (%p231_p3) target bundleno = 425 (0x1a9), region = 40  ;;  %s477_s16 = sshll.u32 (!%p231_p3), %s525_s18, 3 }
   0x8   : > { %s617_s17 = sadd.s32 (!%p231_p3), 8, %s477_s16 }
   0x9   : > { %p478_p6 = scmp.le.s32.totalorder (!%p231_p3), %s617_s17, 8 }
   0xc   : > { %vm293_vm0 = vcmask 3072   ;;  %v535_v0 = vmov 0.0   ;;  %v536_v1 = vmov 0   ;;  %v298_v2 = vld [vmem:[%s637_s3] sm:$0xf]  ;;  %s267_s24 = scalar_select %p266_p4, %s525_s18, 0  ;;  %v330_v10 = vlaneseq }
   0xd   : > { %294 = vst.msk [vmem:[#allocation2] sm:$0xf] %vm293_vm0, %v535_v0  ;;  %508 = vset.pattern.permute.xlu0 %v536_v1  ;;  %509 = vset.pattern.permute.xlu1 %v536_v1  ;;  %v329_v3 = vld [vmem:[%s634_s0] sm:$0xf]  ;;  %s285_s27 = scalar_select %p284_p5, %s525_s18, 1  ;;  %vm304_vm1 = vcmask 261120  }
   0xe   : > { %301 = vperm.xlu0 %508, %v298_v2   ;;  %342 = vperm.xlu1 %509, %v329_v3   ;;  %s645_s24 = smov (!%p266_p4, %s267_s24), 0  ;;  %v476_v4 = vadd.f32 -1.0, %v329_v3  ;;  %v297_v8 = vld [vmem:[%s636_s2] sm:$0x3]  ;;  %v331_v14 = vshrl.u32 %v330_v10, 7 }
   0xf   : > { %s474_s28 = sshll.u32 %s285_s27, 2  ;;  %s470_s29 = sshll.u32 %s645_s24, 3 }
  0x10   : > { %s605_s7 = scalar_lea.vmem %s639_s5, %s474_s28  ;;  %s271_s10 = scalar_lea.vmem %s635_s1, %s470_s29  ;;  %vm332_vm2 = vcmp.lt.s32.totalorder %v331_v14, 3 }
  0x11   : > { %s280_s13 = scalar_lea.vmem %s638_s4, %s645_s24  ;;  %v295_v5 = vld [vmem:[%s271_s10] sm:$0xff] }
  0x12   : > { %v296_v6 = vpack.c.bf16 %v295_v5, %v295_v5  ;;  %v510_v11 = vld [vmem:[%s280_s13] ss:$0 sm:$0xff] }
  0x14   : > { %v309_v7 = vsel %vm304_vm1, %v296_v6, 0 }
  0x15   : > { %318 = vmatpush.bf16.xpose.msra.mxu0 %v309_v7 }
  0x16   : > { %336 = vperm.xlu0 %508, %v476_v4  }
  0x1c   : > { %475 = vmatmul.msk.bf16.vlgmr.msra.gmra.mxu0 %vm304_vm1, %v297_v8 }
  0x80   : > { %v302_v9 = vpop.permute.xlu0 %301  ;;  %v343_v15 = vpop.permute.xlu1 %342 }
  0x88   : > { %v337_v17 = vpop.permute.xlu0 %336 }
  0x99   : > { %v320_v12 = vpop.f32.mrf.mxu0 }
  0x9a   : > { %v321_v13 = vadd.f32 %v320_v12, %v302_v9 }
  0x9c   : > { %v328_v16 = vsub.f32 %v510_v11, %v321_v13 }
  0x9e   : > { %v339_v18 = vmul.f32 %v337_v17, %v328_v16  ;;  %v345_v19 = vmul.f32 %v343_v15, %v328_v16  ;;  %v347_v20 = vmul.f32 %v328_v16, %v328_v16  ;;  %357 = sbr.rel (%p478_p6) target bundleno = 289 (0x121), region = 48 }
  0xa0   : > { %v346_v21 = vmax.f32 %v339_v18, %v345_v19 }
  0xa1   : > { %v322_v22 = vpop.f32.mrf.mxu0 }
  0xa2   : > { %v350_v23 = vsel %vm332_vm2, %v346_v21, %v347_v20 }
  0xa3   : > { %v359_v24 = vand.u32 127, %v330_v10  ;;  %v360_v25 = vstv %s477_s16  ;;  %vm367_vm3 = vcmask 60416   ;;  %v366_v29 = vld [vmem:[#allocation2] sm:$0xf] }
  0xa5   : > { %v361_v26 = vadd.s32 %v360_v25, %v359_v24 }
  0xa7   : > { %vm362_vm4 = vcmp.lt.s32.totalorder %v361_v26, 8 }
  0xa8   : > { %v365_v27 = vsel %vm362_vm4, %v350_v23, 0.0 }
  0xa9   : > { %v368_v28 = vsel %vm367_vm3, %v365_v27, 0.0 }
  0xaa   : > { %369 = vadd.xlane.f32.xlu0 %v368_v28 }
 0x11d   : > { %v370_v30 = vpop.xlane.xlu0 %369 }
 0x11e   : > { %v371_v31 = vadd.f32 %v370_v30, %v366_v29 }
 0x120   : > { %373 = vst.msk [vmem:[#allocation2] sm:$0xf] %vm293_vm0, %v371_v31 }
 0x121 PF: > { %p479_p7 = scmp.gt.s32.totalorder %s617_s17, 8 }
 0x123   : > { %377 = sbr.rel (%p479_p7) target bundleno = 417 (0x1a1), region = 52 }
 0x128   : > { %vm379_vm5 = vcmask 60416   ;;  %v378_v33 = vld [vmem:[#allocation2] sm:$0xf] }
 0x129   : > { %v380_v32 = vsel %vm379_vm5, %v350_v23, 0.0 }
 0x12a   : > { %381 = vadd.xlane.f32.xlu0 %v380_v32 }
 0x19d   : > { %v382_v34 = vpop.xlane.xlu0 %381 }
 0x19e   : > { %v383_v35 = vadd.f32 %v382_v34, %v378_v33 }
 0x1a0   : > { %385 = vst.msk [vmem:[#allocation2] sm:$0xf] %vm293_vm0, %v383_v35 }
 0x1a1 PF:  {}
 0x1a7   : > { %v389_v36 = vld [vmem:[#allocation2] sm:$0xf] }
 0x1a8   : > { %391 = vst.msk [vmem:[%s605_s7] sm:$0xf] %vm293_vm0, %v389_v36 }
 0x1a9 PF: > { %s15_s20 = sadd.s32 1, %s533_s20   ;;  %s640_s18 = smov %s529_s19 }
 0x1aa   : > { %p12_p8 = scmp.ge.s32.totalorder %s15_s20, 4   ;;  %s641_s19 = smov %s643_s21 }
 0x1ac   :  { %14 = sbr.rel (!%p12_p8) target bundleno = 2 (0x2), region = 89 }

</bundles_post_ra>
